<compile_context>
chip_gen: v7x
topology: tpu7x:2x2x1
jax: 0.10.0
libtpu: 0.0.40
codegen_flags: <defaults>
</compile_context>

<pallas_src>
import jax
import jax.numpy as jnp
from jax.experimental import pallas as pl
from jax.experimental.pallas import tpu as pltpu


# --------------------------------------------------------------------------
# Pallas kernel: BiDAF attention flow + fused reduction linear
# --------------------------------------------------------------------------
def bidaf_kernel(q_ref, c_ref, wc_ref, wq_ref, wcq_ref, bs_ref,
                 wred_ref, brd_ref, out_ref):
    q = q_ref[...]            # (QL, H)  query embedding (f32)
    c = c_ref[...]            # (CL, H)  context embedding (f32)
    wc = wc_ref[...]          # (1, H)   att_weight_c  (nn.Linear(H, 1).weight)
    wq = wq_ref[...]          # (1, H)   att_weight_q
    wcq = wcq_ref[...]        # (1, H)   att_weight_cq
    bias_s = bs_ref[0]        # combined bias of the three 1-dim linears (SMEM)

    qb = q.astype(jnp.bfloat16)

    # similarity matrix s: (CL, QL)
    #   s[i, j] = wc.c_i + wq.q_j + sum_h c[i,h]*wcq[h]*q[j,h] + bias
    # The wq.q_j term is folded into the MXU contraction:
    #   (c*wcq + wq) @ q^T  ==  cq + s_q^T      (one matmul, no transposes)
    s_c = jnp.sum(c * wc, axis=-1, keepdims=True)                      # (CL, 1)
    cw = (c * wcq + wq).astype(jnp.bfloat16)                           # (CL, H)
    cq = jax.lax.dot_general(cw, qb, (((1,), (1,)), ((), ())),
                             preferred_element_type=jnp.float32)       # (CL, QL)
    s = s_c + cq + bias_s
    # TODO(synk): at production QL, pad the query axis to a multiple of 128 and
    # mask padded columns with -inf before the softmax to stay lane-dense.

    # context-to-query attention: softmax over the query axis
    s_max = jnp.max(s, axis=-1, keepdims=True)                         # (CL, 1)
    p = jnp.exp(s - s_max)
    a = p * pl.reciprocal(jnp.sum(p, axis=-1, keepdims=True), approx=True)
    c2q = jnp.dot(a.astype(jnp.bfloat16), qb,
                  preferred_element_type=jnp.float32)                  # (CL, H)

    # query-to-context attention: softmax over the context axis of the
    # per-row max of s (s_max is reused -- no second max over s).
    m_max = jnp.max(s_max, axis=0, keepdims=True)                      # (1, 1)
    e = jnp.exp(s_max - m_max)
    b = e * pl.reciprocal(jnp.sum(e, axis=0, keepdims=True), approx=True)
    q2c = jnp.sum(b * c, axis=0, keepdims=True)                        # (1, H)

    # reduction_layer( concat([c, c2q, c*c2q, c*q2c], -1) ) as a single
    # (CL, 4H) @ (4H, O) matmul; each concat slice is exactly H lanes so the
    # concat is adjacent vregs (no cross-lane shuffle).
    lhs = jnp.concatenate([c, c2q, c * c2q, c * q2c],
                          axis=-1).astype(jnp.bfloat16)                # (CL, 4H)
    g = (jnp.dot(lhs, wred_ref[...], preferred_element_type=jnp.float32)
         + brd_ref[...])
    out_ref[...] = g.astype(out_ref.dtype)


def bidaf_pallas(q_emb, c_emb, params):
    QL, H = q_emb.shape
    CL, _ = c_emb.shape
    O = params["w_red"].shape[1]

    w_red_bf = params["w_red"].astype(jnp.bfloat16)   # ship the big weight as bf16

    def fs(shape):
        # full-array block (single grid step), so any shape is legal
        return pl.BlockSpec(shape, lambda i: (0,) * len(shape))

    flops = 2 * CL * QL * H + 2 * CL * QL * H + 2 * CL * (4 * H) * O
    transcendentals = CL * QL + 2 * CL + 2
    bytes_accessed = (4 * (q_emb.size + c_emb.size + 3 * H + 1 + O)
                      + 2 * w_red_bf.size + 4 * CL * O)

    return pl.pallas_call(
        bidaf_kernel,
        grid=(1,),
        in_specs=[
            fs(q_emb.shape), fs(c_emb.shape),
            fs((1, H)), fs((1, H)), fs((1, H)),
            pl.BlockSpec(memory_space=pltpu.MemorySpace.SMEM),   # scalar bias
            fs((4 * H, O)), fs((1, O)),
        ],
        out_specs=fs((CL, O)),
        out_shape=jax.ShapeDtypeStruct((CL, O), jnp.float32),
        compiler_params=pltpu.CompilerParams(
            dimension_semantics=("arbitrary",)),
        cost_estimate=pl.CostEstimate(flops=flops,
                                      transcendentals=transcendentals,
                                      bytes_accessed=bytes_accessed),
    )(q_emb, c_emb,
      params["w_c"], params["w_q"], params["w_cq"], params["b_s"],
      w_red_bf, params["b_red"])
    # TODO(synk): for realistic BERT sizes (CL in the thousands, H=768/1024)
    # tile CL over a "parallel" grid axis (two-pass q2c softmax) and set
    # vmem_limit_bytes explicitly -- v7x has only 64 MiB VMEM vs 128 MiB.


# --------------------------------------------------------------------------
# Pure-JAX reference (mirrors BiDAFNet.forward) for correctness checking
# --------------------------------------------------------------------------
def bidaf_ref(q, c, params):
    s = (jnp.sum(c * params["w_c"], -1, keepdims=True)
         + jnp.sum(q * params["w_q"], -1, keepdims=True).T
         + (c * params["w_cq"]) @ q.T
         + params["b_s"][0])
    a = jax.nn.softmax(s, axis=-1)
    c2q = a @ q
    b = jax.nn.softmax(jnp.max(s, axis=-1), axis=0)[:, None]
    q2c = jnp.sum(b * c, axis=0, keepdims=True)
    x = jnp.concatenate([c, c2q, c * c2q, c * q2c], axis=-1)
    return x @ params["w_red"] + params["b_red"]


# --------------------------------------------------------------------------
# Encoder wrapper: token handling + synthetic "BERT" embedding + BiDAF kernel
# --------------------------------------------------------------------------
class PallasEncoder:
    def __init__(self, key, text_length=64, pad_token_id=0,
                 vocab_size=100, hidden_size=128, output_size=128):
        self.text_length = text_length
        self.pad_token_id = pad_token_id
        ks = jax.random.split(key, 5)
        H, O = hidden_size, output_size
        # TODO(synk): pretrained BertModel/BertTokenizer replaced by a
        # deterministic synthetic embedding table (no checkpoint loading).
        self.emb_table = jax.random.normal(ks[0], (vocab_size, H), jnp.float32) * 0.1
        self.params = {
            "w_c":   jax.random.normal(ks[1], (1, H), jnp.float32) * 0.05,
            "w_q":   jax.random.normal(ks[2], (1, H), jnp.float32) * 0.05,
            "w_cq":  jax.random.normal(ks[3], (1, H), jnp.float32) * 0.05,
            # biases of the three (H -> 1) linears collapse into one scalar
            "b_s":   jnp.full((1,), 0.01, jnp.float32),
            # (4H -> O) reduction linear, pre-concatenated along the input axis
            "w_red": jax.random.normal(ks[4], (4 * H, O), jnp.float32) * 0.05,
            "b_red": jnp.zeros((1, O), jnp.float32),
        }

    def forward(self, q_token_ids, c_token_ids):
        len_q = q_token_ids.shape[0]
        len_c = c_token_ids.shape[0]
        # truncation logic (same rule as the PyTorch module)
        if len_q + len_c > self.text_length:
            cut = self.text_length
            if len_c >= len_q:
                c_token_ids = c_token_ids[:cut]
                len_c = c_token_ids.shape[0]
            else:
                q_token_ids = q_token_ids[:cut]
                len_q = q_token_ids.shape[0]
        all_ids = jnp.concatenate([q_token_ids, c_token_ids])
        if all_ids.shape[0] < self.text_length:
            pad = jnp.full((self.text_length - all_ids.shape[0],),
                           self.pad_token_id, all_ids.dtype)
            all_ids = jnp.concatenate([all_ids, pad])
        # synthetic encoder: embedding lookup stands in for the BERT stack
        hidden = self.emb_table[all_ids]                  # (text_length, H)
        q_emb = hidden[:len_q]
        c_emb = hidden[len_q:len_q + len_c]
        return bidaf_pallas(q_emb, c_emb, self.params)    # (c_len, output_size)


if __name__ == "__main__":
    key = jax.random.PRNGKey(0)
    k_enc, k_q, k_c = jax.random.split(key, 3)

    enc = PallasEncoder(k_enc, text_length=64, vocab_size=100,
                        hidden_size=128, output_size=128)

    q_ids = jax.random.randint(k_q, (8,), 1, 100, dtype=jnp.int32)
    c_ids = jax.random.randint(k_c, (16,), 1, 100, dtype=jnp.int32)

    g = enc.forward(q_ids, c_ids)
    g = jax.block_until_ready(g)

    # correctness check against a pure-JAX (f32) BiDAF reference; tolerance
    # accounts for bf16 MXU inputs and approx reciprocals in the kernel.
    q_emb = enc.emb_table[q_ids]
    c_emb = enc.emb_table[c_ids]
    g_ref = bidaf_ref(q_emb, c_emb, enc.params)
    assert g.shape == (16, 128)
    assert jnp.allclose(g, g_ref, atol=2e-2, rtol=2e-2), "mismatch vs reference"

    print("KERNEL_OK")
</pallas_src>

<mosaic_0001>
module attributes {stable_mosaic.version = 11 : i64} {
  func.func @bidaf_kernel(%arg0: i32, %arg1: memref<8x128xf32, #tpu.memory_space<vmem>>, %arg2: memref<16x128xf32, #tpu.memory_space<vmem>>, %arg3: memref<1x128xf32, #tpu.memory_space<vmem>>, %arg4: memref<1x128xf32, #tpu.memory_space<vmem>>, %arg5: memref<1x128xf32, #tpu.memory_space<vmem>>, %arg6: memref<1xf32, #tpu.memory_space<smem>>, %arg7: memref<512x128xbf16, #tpu.memory_space<vmem>>, %arg8: memref<1x128xf32, #tpu.memory_space<vmem>>, %arg9: memref<16x128xf32, #tpu.memory_space<vmem>>) attributes {dimension_semantics = [#tpu.dimension_semantics<arbitrary>], iteration_bounds = array<i64: 1>, scalar_prefetch = 0 : i64, scratch_operands = 0 : i64, tpu.core_type = #tpu.core_type<tc>, window_params = [{pipeline_mode = #tpu.pipeline_mode<synchronous>, transform_indices = @transform_0, window_bounds = array<i64: 8, 128>}, {pipeline_mode = #tpu.pipeline_mode<synchronous>, transform_indices = @transform_1, window_bounds = array<i64: 16, 128>}, {pipeline_mode = #tpu.pipeline_mode<synchronous>, transform_indices = @transform_2, window_bounds = array<i64: 1, 128>}, {pipeline_mode = #tpu.pipeline_mode<synchronous>, transform_indices = @transform_3, window_bounds = array<i64: 1, 128>}, {pipeline_mode = #tpu.pipeline_mode<synchronous>, transform_indices = @transform_4, window_bounds = array<i64: 1, 128>}, {transform_indices = @transform_5, window_bounds = array<i64: 1>}, {pipeline_mode = #tpu.pipeline_mode<synchronous>, transform_indices = @transform_6, window_bounds = array<i64: 512, 128>}, {pipeline_mode = #tpu.pipeline_mode<synchronous>, transform_indices = @transform_7, window_bounds = array<i64: 1, 128>}, {pipeline_mode = #tpu.pipeline_mode<synchronous>, transform_indices = @transform_8, window_bounds = array<i64: 16, 128>}]} {
    %c0 = arith.constant 0 : index
    %c0_0 = arith.constant 0 : index
    %0 = vector.load %arg1[%c0, %c0_0] : memref<8x128xf32, #tpu.memory_space<vmem>>, vector<8x128xf32>
    %c0_1 = arith.constant 0 : index
    %c0_2 = arith.constant 0 : index
    %1 = vector.load %arg2[%c0_1, %c0_2] : memref<16x128xf32, #tpu.memory_space<vmem>>, vector<16x128xf32>
    %c0_3 = arith.constant 0 : index
    %c0_4 = arith.constant 0 : index
    %2 = vector.load %arg3[%c0_3, %c0_4] : memref<1x128xf32, #tpu.memory_space<vmem>>, vector<1x128xf32>
    %c0_5 = arith.constant 0 : index
    %c0_6 = arith.constant 0 : index
    %3 = vector.load %arg4[%c0_5, %c0_6] : memref<1x128xf32, #tpu.memory_space<vmem>>, vector<1x128xf32>
    %c0_7 = arith.constant 0 : index
    %c0_8 = arith.constant 0 : index
    %4 = vector.load %arg5[%c0_7, %c0_8] : memref<1x128xf32, #tpu.memory_space<vmem>>, vector<1x128xf32>
    %c0_9 = arith.constant 0 : index
    %5 = memref.load %arg6[%c0_9] : memref<1xf32, #tpu.memory_space<smem>>
    %6 = arith.truncf %0 : vector<8x128xf32> to vector<8x128xbf16>
    %7 = vector.broadcast %2 : vector<1x128xf32> to vector<16x128xf32>
    %8 = arith.mulf %1, %7 : vector<16x128xf32>
    %cst = arith.constant dense<0.000000e+00> : vector<16xf32>
    %9 = vector.multi_reduction <add>, %8, %cst [1] : vector<16x128xf32> to vector<16xf32>
    %10 = vector.shape_cast %9 : vector<16xf32> to vector<16x1xf32>
    %11 = vector.broadcast %4 : vector<1x128xf32> to vector<16x128xf32>
    %12 = arith.mulf %1, %11 : vector<16x128xf32>
    %13 = vector.broadcast %3 : vector<1x128xf32> to vector<16x128xf32>
    %14 = arith.addf %12, %13 : vector<16x128xf32>
    %15 = arith.truncf %14 : vector<16x128xf32> to vector<16x128xbf16>
    %cst_10 = arith.constant dense<0.000000e+00> : vector<16x8xf32>
    %16 = tpu.matmul %15, %6, %cst_10 {dimension_numbers = #tpu.dot_dimension_numbers<[1], [1], [0], [0], [0, 0, 1, 0], [], []>} : vector<16x128xbf16>, vector<8x128xbf16>, vector<16x8xf32> -> vector<16x8xf32>
    %17 = vector.broadcast %10 : vector<16x1xf32> to vector<16x8xf32>
    %18 = arith.addf %17, %16 : vector<16x8xf32>
    %19 = vector.broadcast %5 : f32 to vector<16x8xf32>
    %20 = arith.addf %18, %19 : vector<16x8xf32>
    %cst_11 = arith.constant dense<0xFF800000> : vector<16xf32>
    %21 = vector.multi_reduction <maximumf>, %20, %cst_11 [1] : vector<16x8xf32> to vector<16xf32>
    %22 = vector.shape_cast %21 : vector<16xf32> to vector<16x1xf32>
    %23 = vector.broadcast %22 : vector<16x1xf32> to vector<16x8xf32>
    %24 = arith.subf %20, %23 : vector<16x8xf32>
    %25 = math.exp %24 : vector<16x8xf32>
    %cst_12 = arith.constant dense<0.000000e+00> : vector<16xf32>
    %26 = vector.multi_reduction <add>, %25, %cst_12 [1] : vector<16x8xf32> to vector<16xf32>
    %27 = vector.shape_cast %26 : vector<16xf32> to vector<16x1xf32>
    %28 = tpu.reciprocal %27 {approx = true} : vector<16x1xf32> -> vector<16x1xf32>
    %29 = vector.broadcast %28 : vector<16x1xf32> to vector<16x8xf32>
    %30 = arith.mulf %25, %29 : vector<16x8xf32>
    %31 = arith.truncf %30 : vector<16x8xf32> to vector<16x8xbf16>
    %cst_13 = arith.constant dense<0.000000e+00> : vector<16x128xf32>
    %32 = tpu.matmul %31, %6, %cst_13 {dimension_numbers = #tpu.dot_dimension_numbers<[1], [0], [0], [1], [0, 0, 1, 1], [], []>} : vector<16x8xbf16>, vector<8x128xbf16>, vector<16x128xf32> -> vector<16x128xf32>
    %cst_14 = arith.constant dense<0xFF800000> : vector<1xf32>
    %33 = vector.multi_reduction <maximumf>, %22, %cst_14 [0] : vector<16x1xf32> to vector<1xf32>
    %34 = vector.shape_cast %33 : vector<1xf32> to vector<1x1xf32>
    %35 = vector.broadcast %34 : vector<1x1xf32> to vector<16x1xf32>
    %36 = arith.subf %22, %35 : vector<16x1xf32>
    %37 = math.exp %36 : vector<16x1xf32>
    %cst_15 = arith.constant dense<0.000000e+00> : vector<1xf32>
    %38 = vector.multi_reduction <add>, %37, %cst_15 [0] : vector<16x1xf32> to vector<1xf32>
    %39 = vector.shape_cast %38 : vector<1xf32> to vector<1x1xf32>
    %40 = tpu.reciprocal %39 {approx = true} : vector<1x1xf32> -> vector<1x1xf32>
    %41 = vector.broadcast %40 : vector<1x1xf32> to vector<16x1xf32>
    %42 = arith.mulf %37, %41 : vector<16x1xf32>
    %43 = vector.broadcast %42 : vector<16x1xf32> to vector<16x128xf32>
    %44 = arith.mulf %43, %1 : vector<16x128xf32>
    %cst_16 = arith.constant dense<0.000000e+00> : vector<128xf32>
    %45 = vector.multi_reduction <add>, %44, %cst_16 [0] : vector<16x128xf32> to vector<128xf32>
    %46 = vector.shape_cast %45 : vector<128xf32> to vector<1x128xf32>
    %47 = arith.mulf %1, %32 : vector<16x128xf32>
    %48 = vector.broadcast %46 : vector<1x128xf32> to vector<16x128xf32>
    %49 = arith.mulf %1, %48 : vector<16x128xf32>
    %50 = tpu.concatenate %1, %32, %47, %49 in 1 : vector<16x128xf32>, vector<16x128xf32>, vector<16x128xf32>, vector<16x128xf32> -> vector<16x512xf32>
    %51 = arith.truncf %50 : vector<16x512xf32> to vector<16x512xbf16>
    %c0_17 = arith.constant 0 : index
    %c0_18 = arith.constant 0 : index
    %52 = vector.load %arg7[%c0_17, %c0_18] : memref<512x128xbf16, #tpu.memory_space<vmem>>, vector<512x128xbf16>
    %cst_19 = arith.constant dense<0.000000e+00> : vector<16x128xf32>
    %53 = tpu.matmul %51, %52, %cst_19 {dimension_numbers = #tpu.dot_dimension_numbers<[1], [0], [0], [1], [0, 0, 1, 1], [], []>} : vector<16x512xbf16>, vector<512x128xbf16>, vector<16x128xf32> -> vector<16x128xf32>
    %c0_20 = arith.constant 0 : index
    %c0_21 = arith.constant 0 : index
    %54 = vector.load %arg8[%c0_20, %c0_21] : memref<1x128xf32, #tpu.memory_space<vmem>>, vector<1x128xf32>
    %55 = vector.broadcast %54 : vector<1x128xf32> to vector<16x128xf32>
    %56 = arith.addf %53, %55 : vector<16x128xf32>
    %c0_22 = arith.constant 0 : index
    %c0_23 = arith.constant 0 : index
    %57 = vector.load %arg9[%c0_22, %c0_23] : memref<16x128xf32, #tpu.memory_space<vmem>>, vector<16x128xf32>
    tpu.vector_store %arg9[%c0_22, %c0_23], %56 {strides = array<i32>} : memref<16x128xf32, #tpu.memory_space<vmem>>, vector<16x128xf32>,
    return
  }
  func.func @transform_0(%arg0: i32) -> (i32, i32) {
    %c0_i32 = arith.constant 0 : i32
    %c0_i32_0 = arith.constant 0 : i32
    %c0_i32_1 = arith.constant 0 : i32
    return %c0_i32, %c0_i32_0 : i32, i32
  }
  func.func @transform_1(%arg0: i32) -> (i32, i32) {
    %c0_i32 = arith.constant 0 : i32
    %c0_i32_0 = arith.constant 0 : i32
    %c0_i32_1 = arith.constant 0 : i32
    return %c0_i32, %c0_i32_0 : i32, i32
  }
  func.func @transform_2(%arg0: i32) -> (i32, i32) {
    %c0_i32 = arith.constant 0 : i32
    %c0_i32_0 = arith.constant 0 : i32
    %c0_i32_1 = arith.constant 0 : i32
    return %c0_i32, %c0_i32_0 : i32, i32
  }
  func.func @transform_3(%arg0: i32) -> (i32, i32) {
    %c0_i32 = arith.constant 0 : i32
    %c0_i32_0 = arith.constant 0 : i32
    %c0_i32_1 = arith.constant 0 : i32
    return %c0_i32, %c0_i32_0 : i32, i32
  }
  func.func @transform_4(%arg0: i32) -> (i32, i32) {
    %c0_i32 = arith.constant 0 : i32
    %c0_i32_0 = arith.constant 0 : i32
    %c0_i32_1 = arith.constant 0 : i32
    return %c0_i32, %c0_i32_0 : i32, i32
  }
  func.func @transform_5(%arg0: i32) -> i32 {
    %c0_i32 = arith.constant 0 : i32
    %c0_i32_0 = arith.constant 0 : i32
    return %c0_i32 : i32
  }
  func.func @transform_6(%arg0: i32) -> (i32, i32) {
    %c0_i32 = arith.constant 0 : i32
    %c0_i32_0 = arith.constant 0 : i32
    %c0_i32_1 = arith.constant 0 : i32
    return %c0_i32, %c0_i32_0 : i32, i32
  }
  func.func @transform_7(%arg0: i32) -> (i32, i32) {
    %c0_i32 = arith.constant 0 : i32
    %c0_i32_0 = arith.constant 0 : i32
    %c0_i32_1 = arith.constant 0 : i32
    return %c0_i32, %c0_i32_0 : i32, i32
  }
  func.func @transform_8(%arg0: i32) -> (i32, i32) {
    %c0_i32 = arith.constant 0 : i32
    %c0_i32_0 = arith.constant 0 : i32
    %c0_i32_1 = arith.constant 0 : i32
    return %c0_i32, %c0_i32_0 : i32, i32
  }
}

</mosaic_0001>

<bundles_post_ra>
// kernel: tpu_custom_call.1
= control target key start
LH: loop header
LB: loop body
LE: loop exit
PB: predicated region body
PF: predicated region fallthrough
CT: control target
= control target key end

     0   :  { %14 = vsyncpa [#allocation4], 0  ;;  %s1031_s0 = inlined_call_operand.hbm [shape: f32[8,128], index: 0, kind: input, shape index: {}]   ;;  %s1032_s1 = inlined_call_operand.hbm [shape: f32[16,128], index: 1, kind: input, shape index: {}]   ;;  %s1033_s2 = inlined_call_operand.vmem [shape: f32[1,128], index: 2, kind: input, shape index: {}]   ;;  %s1034_s3 = inlined_call_operand.vmem [shape: f32[1,128], index: 3, kind: input, shape index: {}]   ;;  %s1035_s4 = inlined_call_operand.vmem [shape: f32[1,128], index: 4, kind: input, shape index: {}]   ;;  %s1036_s5 = inlined_call_operand.<no memory space> [shape: f32[1], index: 5, kind: input, shape index: {}]   ;;  %s1037_s6 = inlined_call_operand.hbm [shape: bf16[512,128], index: 6, kind: input, shape index: {}]   ;;  %s1038_s7 = inlined_call_operand.vmem [shape: f32[1,128], index: 7, kind: input, shape index: {}]   ;;  %s1039_s8 = inlined_call_operand.hbm [shape: f32[16,128], index: 8, kind: output, shape index: {}]  }
   0x1   :  { %15 = vsyncpa [#allocation7], 0 }
   0x2   :  { %16 = vsyncpa [#allocation5], 0  ;;  %s878_s27 = smov [#allocation6]   ;;  %s784_s9 = scalar_lea.hbm %s1032_s1, 256 }
   0x3   :  { %s32_s28 = sshll.u32 %s878_s27, 4  ;;  %p785_p0 = scmp.ne.s32.totalorder %s1032_s1, %s784_s9  ;;  %s33_s28 = int_to_ptr.vmem [resolvable:$true] %s32_s28 }
   0x4   :  { %p788_p1 = scmp.lt.u32.totalorder %s784_s9, %s1032_s1 }
   0x6   :  { %p790_p2 = pnand %p788_p1, %p785_p0 }
   0x8   :  { %793 = shalt.err (!%p790_p2)
}
   0x9   :  { %s794_s14 = scalar_lea.vmem %s33_s28, 256  ;;  %p799_p4 = scmp.lt.s32.totalorder %s33_s28, %s33_s28 }
   0xa   :  { %p795_p3 = scmp.ne.s32.totalorder %s33_s28, %s794_s14  ;;  %p800_p5 = scmp.lt.s32.totalorder %s794_s14, %s794_s14 }
   0xc   :  { %p801_p6 = por %p800_p5, %p799_p4 }
   0xe   :  { %p802_p7 = pnand %p801_p6, %p795_p3 }
  0x10   :  { %805 = shalt.err (!%p802_p7)
}
  0x11   :  { %s879_s15 = smov 128   ;;  %s880_s16 = smov 8  }
  0x12   :  { %38 = dma.hbm_to_vmem [thread:$0]  %s1032_s1, 256, %s33_s28, [#allocation7], %s879_s15, %s879_s15, %s880_s16  }
  0x13   :  { %s881_s19 = smov [#allocation3]   ;;  %s882_s21 = smov [#allocation8]  }
  0x14   :  { %s23_s20 = sshll.u32 %s881_s19, 4  ;;  %s52_s22 = sshll.u32 %s882_s21, 4  ;;  %s24_s20 = int_to_ptr.vmem [resolvable:$true] %s23_s20  ;;  %s53_s22 = int_to_ptr.vmem [resolvable:$true] %s52_s22 }
  0x15   :  { %s806_s25 = scalar_lea.hbm %s1031_s0, 128 }
  0x16   :  { %p807_p8 = scmp.ne.s32.totalorder %s1031_s0, %s806_s25  ;;  %p810_p9 = scmp.lt.u32.totalorder %s806_s25, %s1031_s0 }
  0x18   :  { %p812_p10 = pnand %p810_p9, %p807_p8 }
  0x1a   :  { %815 = shalt.err (!%p812_p10)
}
  0x1b   :  { %s816_s1 = scalar_lea.vmem %s24_s20, 128  ;;  %p821_p12 = scmp.lt.s32.totalorder %s24_s20, %s24_s20 }
  0x1c   :  { %p817_p11 = scmp.ne.s32.totalorder %s24_s20, %s816_s1  ;;  %p822_p13 = scmp.lt.s32.totalorder %s816_s1, %s816_s1 }
  0x1e   :  { %p823_p0 = por %p822_p13, %p821_p12 }
  0x20   :  { %p824_p1 = pnand %p823_p0, %p817_p11 }
  0x22   :  { %827 = shalt.err (!%p824_p1)
}
  0x23   :  { %26 = dma.hbm_to_vmem [thread:$0]  %s1031_s0, 128, %s24_s20, [#allocation4]  }
  0x24   :  { %s828_s12 = scalar_lea.hbm %s1037_s6, 4096 }
  0x25   :  { %p829_p2 = scmp.ne.s32.totalorder %s1037_s6, %s828_s12  ;;  %p832_p3 = scmp.lt.u32.totalorder %s828_s12, %s1037_s6 }
  0x27   :  { %p834_p4 = pnand %p832_p3, %p829_p2 }
  0x29   :  { %837 = shalt.err (!%p834_p4)
}
  0x2a   :  { %s838_s19 = scalar_lea.vmem %s53_s22, 4096  ;;  %p843_p6 = scmp.lt.s32.totalorder %s53_s22, %s53_s22 }
  0x2b   :  { %p839_p5 = scmp.ne.s32.totalorder %s53_s22, %s838_s19  ;;  %p844_p7 = scmp.lt.s32.totalorder %s838_s19, %s838_s19 }
  0x2d   :  { %p845_p8 = por %p844_p7, %p843_p6 }
  0x2f   :  { %p846_p9 = pnand %p845_p8, %p839_p5 }
  0x31   :  { %849 = shalt.err (!%p846_p9)
}
  0x32   :  { %s883_s0 = smov 64   ;;  %s884_s20 = smov 4  }
  0x33   :  { %58 = dma.hbm_to_vmem [thread:$0]  %s1037_s6, 4096, %s53_s22, [#allocation7], %s883_s0, %s883_s0, %s884_s20  }
  0x34   :  { %872 = dma.done.wait [#allocation4], 128  }
  0x35   :  { %873 = vsyncadd [#allocation4], 4294967168 }
  0x36   :  { %874 = dma.done.wait [#allocation7], 4352  }
  0x37   :  { %875 = vsyncadd [#allocation7], 4294962944  ;;  %v885_v0 = vmov 0.0   ;;  %vm886_vm0 = vmmov 0   ;;  %v71_v1 = vld [vmem:[#allocation3] sm:$0xff]  ;;  %v972_v2 = vld [vmem:[#allocation6] sm:$0xff]  ;;  %v151_v18 = vstv %s1036_s5 }
  0x38   :  { %716 = vmatprep.subr.bf16.mxu0 %v885_v0  ;;  %718 = vmatprep.mubr.msk.bf16.mxu0 %vm886_vm0, %v885_v0  ;;  %v974_v3 = vld [vmem:[#allocation6 + $0x8] sm:$0xff]  ;;  %v78_v4 = vpack.c.bf16 %v71_v1, %v71_v1  ;;  %v633_v5 = vld [vmem:[%s1034_s3] ss:$0 sm:$0xff]  ;;  %vm154_vm1 = vcmask 64512   ;;  %vm181_vm2 = vcmask 1043456   ;;  %v738_v59 = vld [vmem:[#allocation8 + $0x40] sm:$0xff]  }
  0x39   :  { %722 = vmatprep.subr.bf16.mxu1 %v885_v0  ;;  %724 = vmatprep.mubr.msk.bf16.mxu1 %vm886_vm0, %v885_v0  ;;  %v632_v6 = vld [vmem:[%s1035_s4] ss:$0 sm:$0xff]  ;;  %v740_v60 = vld [vmem:[#allocation8 + $0xc0] sm:$0xff]   ;;  %v748_v1 = vld [vmem:[#allocation8 + $0xd0] sm:$0xff]   ;;  %s887_s29 = smov [#allocation9]  }
  0x3a   :  { %v631_v7 = vld [vmem:[%s1033_s2] ss:$0 sm:$0xff]  ;;  %v97_v8 = vmul.f32 %v632_v6, %v972_v2  ;;  %v98_v9 = vmul.f32 %v632_v6, %v974_v3  ;;  %717 = vmatpush3.bf16.xpose.msra.mxu0 %v78_v4  ;;  %v183_v52 = vsel %vm181_vm2, %v78_v4, 0  ;;  %v741_v61 = vld [vmem:[#allocation8 + $0x80] sm:$0xff]   ;;  %v749_v4 = vld [vmem:[#allocation8 + $0x90] sm:$0xff]   ;;  %s618_s30 = sshll.u32 %s887_s29, 4  ;;  %s619_s30 = int_to_ptr.vmem [resolvable:$true] %s618_s30 }
  0x3b   :  { %v85_v10 = vmul.f32 %v631_v7, %v972_v2  ;;  %v86_v13 = vmul.f32 %v631_v7, %v974_v3  ;;  %723 = vmatpush3.bf16.msra.mxu1 %v183_v52  ;;  %694 = vmatprep.subr.bf16.mxu0 %v740_v60  ;;  %v744_v62 = vld [vmem:[#allocation8 + $0xc8] sm:$0xff]   ;;  %p855_p11 = scmp.lt.s32.totalorder %s619_s30, %s619_s30 }
  0x3c   :  { %v105_v11 = vadd.f32 %v633_v5, %v97_v8  ;;  %v106_v12 = vadd.f32 %v633_v5, %v98_v9  ;;  %672 = vmatprep.subr.bf16.mxu1 %v738_v59  ;;  %v745_v63 = vld [vmem:[#allocation8 + $0x88] sm:$0xff]   ;;  %v752_v9 = vld [vmem:[#allocation8 + $0xd8] sm:$0xff]  }
  0x3d   :  { %87 = vadd.xlane.f32.xlu0 %v85_v10  ;;  %v753_v10 = vld [vmem:[#allocation8 + $0x98] sm:$0xff]  }
  0x3e   :  { %v107_v14 = vpack.c.bf16 %v106_v12, %v105_v11 }
  0x41   :  { %89 = vadd.xlane.f32.xlu0 %v86_v13  ;;  %719 = vmatmul.mubr.bf16.vlgmr.msra.gmra.mrb[0].mxu0 %v107_v14  ;;  %v756_v13 = vld [vmem:[#allocation8 + $0xe0] sm:$0xff]  }
  0x42   :  { %695 = vmatpush3.bf16.msra.mxu0 %v741_v61  ;;  %v757_v14 = vld [vmem:[#allocation8 + $0xa0] sm:$0xff]   ;;  %v635_v61 = vld [vmem:[%s1038_s7] ss:$0 sm:$0xff]  ;;  %s850_s7 = scalar_lea.vmem %s619_s30, 256 }
  0x43   :  { %696 = vmatprep.subr.bf16.mxu0 %v744_v62  ;;  %p851_p10 = scmp.ne.s32.totalorder %s619_s30, %s850_s7  ;;  %p856_p12 = scmp.lt.s32.totalorder %s850_s7, %s850_s7 }
  0x45   :  { %p857_p13 = por %p856_p12, %p855_p11 }
  0x46   :  { %697 = vmatpush3.bf16.msra.mxu0 %v745_v63 }
  0x47   :  { %698 = vmatprep.subr.bf16.mxu0 %v748_v1  ;;  %p858_p0 = pnand %p857_p13, %p851_p10 }
  0x4a   :  { %699 = vmatpush3.bf16.msra.mxu0 %v749_v4 }
  0x4b   :  { %700 = vmatprep.subr.bf16.mxu0 %v752_v9 }
  0x4e   :  { %701 = vmatpush3.bf16.msra.mxu0 %v753_v10 }
  0x4f   :  { %702 = vmatprep.subr.bf16.mxu0 %v756_v13 }
  0x52   :  { %703 = vmatpush3.bf16.msra.mxu0 %v757_v14 }
  0xca   :  { %v88_v15 = vpop.xlane.xlu0 %87 }
  0xce   :  { %v90_v17 = vpop.xlane.xlu0 %89 }
 0x114   :  { %v142_v16 = vpop.f32.mrb[0].mxu0 }
 0x115   :  { %v149_v19 = vadd.f32 %v142_v16, %v88_v15  ;;  %v720_v20 = vpop.f32.mrb[1].mxu0 }
 0x116   :  { %v145_v21 = vpop.f32.mrb[2].mxu0 }
 0x117   :  { %v150_v22 = vadd.f32 %v145_v21, %v90_v17  ;;  %v721_v23 = vpop.f32.mrb[3].mxu0  ;;  %v152_v24 = vadd.f32 %v151_v18, %v149_v19  ;;  %v760_v17 = vld [vmem:[#allocation8 + $0xe8] sm:$0xff]   ;;  %v764_v21 = vld [vmem:[#allocation8 + $0xf0] sm:$0xff]  }
 0x118   :  { %704 = vmatprep.subr.bf16.mxu0 %v760_v17 }
 0x119   :  { %v155_v25 = vsel %vm154_vm1, %v152_v24, -inf  ;;  %v153_v26 = vadd.f32 %v151_v18, %v150_v22  ;;  %v761_v18 = vld [vmem:[#allocation8 + $0xa8] sm:$0xff]  }
 0x11a   :  { %156 = vmax.xlane.f32.xlu1 %v155_v25  ;;  %705 = vmatpush3.bf16.msra.mxu0 %v761_v18 }
 0x11b   :  { %v158_v27 = vsel %vm154_vm1, %v153_v26, -inf  ;;  %706 = vmatprep.subr.bf16.mxu0 %v764_v21 }
 0x11e   :  { %159 = vmax.xlane.f32.xlu1 %v158_v27 }
 0x1a7   :  { %v157_v28 = vpop.xlane.xlu1 %156 }
 0x1a8   :  { %v161_v29 = vsub.f32 %v152_v24, %v157_v28 }
 0x1aa   :  { %v163_v30 = vmul.f32 1.442695, %v161_v29 }
 0x1ab   :  { %v160_v31 = vpop.xlane.xlu1 %159 }
 0x1ac   :  { %770 = vpow2.f32 %v163_v30  ;;  %v162_v32 = vsub.f32 %v153_v26, %v160_v31  ;;  %v226_v33 = vmax.f32 %v157_v28, %v160_v31 }
 0x1ae   :  { %v165_v34 = vmul.f32 1.442695, %v162_v32  ;;  %v227_v35 = vrot.slane %v226_v33, 4  ;;  %v739_v32 = vld [vmem:[#allocation8] sm:$0xff]  }
 0x1b0   :  { %772 = vpow2.f32 %v165_v34  ;;  %v228_v36 = vmax.f32 %v226_v33, %v227_v35  ;;  %v742_v34 = vld [vmem:[#allocation8 + $0x48] sm:$0xff]  }
 0x1b1   :  { %v743_v35 = vld [vmem:[#allocation8 + $0x8] sm:$0xff]  }
 0x1b2   :  { %v229_v37 = vrot.slane %v228_v36, 2 }
 0x1b4   :  { %v230_v38 = vmax.f32 %v228_v36, %v229_v37  ;;  %v746_v36 = vld [vmem:[#allocation8 + $0x50] sm:$0xff]  }
 0x1b5   :  { %v747_v37 = vld [vmem:[#allocation8 + $0x10] sm:$0xff]  }
 0x1b6   :  { %v994_v39 = vpop.eup %770  ;;  %v231_v40 = vrot.slane %v230_v38, 1 }
 0x1b7   :  { %v167_v41 = vsel %vm154_vm1, %v994_v39, 0.0 }
 0x1b8   :  { %v232_v42 = vmax.f32 %v230_v38, %v231_v40  ;;  %168 = vadd.xlane.f32.xlu0 %v167_v41  ;;  %v750_v38 = vld [vmem:[#allocation8 + $0x58] sm:$0xff]   ;;  %v754_v41 = vld [vmem:[#allocation8 + $0x60] sm:$0xff]  }
 0x1b9   :  { %v751_v40 = vld [vmem:[#allocation8 + $0x18] sm:$0xff]  }
 0x1ba   :  { %v998_v43 = vpop.eup %772  ;;  %v233_v44 = vsub.f32 %v157_v28, %v232_v42  ;;  %v234_v45 = vsub.f32 %v160_v31, %v232_v42  ;;  %v758_v42 = vld [vmem:[#allocation8 + $0x68] sm:$0xff]  }
 0x1bb   :  { %v170_v46 = vsel %vm154_vm1, %v998_v43, 0.0 }
 0x1bc   :  { %v235_v47 = vmul.f32 1.442695, %v233_v44  ;;  %v237_v48 = vmul.f32 1.442695, %v234_v45  ;;  %171 = vadd.xlane.f32.xlu1 %v170_v46  ;;  %v762_v44 = vld [vmem:[#allocation8 + $0x70] sm:$0xff]  }
 0x1bd   :  { %v763_v45 = vld [vmem:[#allocation8 + $0x30] sm:$0xff]  }
 0x1be   :  { %774 = vpow2.f32 %v235_v47  ;;  %v765_v46 = vld [vmem:[#allocation8 + $0xb0] sm:$0xff]   ;;  %v766_v47 = vld [vmem:[#allocation8 + $0x78] sm:$0xff]  }
 0x1bf   :  { %776 = vpow2.f32 %v237_v48  ;;  %707 = vmatpush3.bf16.msra.mxu0 %v765_v46  ;;  %v767_v48 = vld [vmem:[#allocation8 + $0x38] sm:$0xff]  }
 0x1c8   :  { %v775_v49 = vpop.eup %774 }
 0x1c9   :  { %v777_v50 = vpop.eup %776 }
 0x1ca   :  { %v239_v51 = vadd.f32 %v777_v50, %v775_v49 }
 0x1cc   :  { %v240_v53 = vrot.slane %v239_v51, 4 }
 0x1ce   :  { %v241_v54 = vadd.f32 %v240_v53, %v239_v51 }
 0x1d0   :  { %v242_v55 = vrot.slane %v241_v54, 2 }
 0x1d2   :  { %v243_v56 = vadd.f32 %v242_v55, %v241_v54  ;;  %v262_v54 = vpack.c.bf16 %v974_v3, %v972_v2 }
 0x1d4   :  { %v244_v57 = vrot.slane %v243_v56, 1 }
 0x1d6   :  { %v245_v58 = vadd.f32 %v244_v57, %v243_v56 }
 0x1d8   :  { %778 = vrcp.f32 %v245_v58 }
 0x1e2   :  { %v779_v0 = vpop.eup %778 }
 0x1e3   :  { %v248_v5 = vmul.f32 %v779_v0, %v777_v50  ;;  %v247_v6 = vmul.f32 %v779_v0, %v775_v49  ;;  %v768_v49 = vld [vmem:[#allocation8 + $0xf8] sm:$0xff]  }
 0x1e4   :  { %v769_v50 = vld [vmem:[#allocation8 + $0xb8] sm:$0xff]   ;;  %708 = vmatprep.subr.bf16.mxu0 %v768_v49 }
 0x1e5   :  { %v249_v7 = vmul.f32 %v247_v6, %v972_v2  ;;  %v250_v8 = vmul.f32 %v248_v5, %v974_v3  ;;  %709 = vmatpush3.bf16.msra.mxu0 %v769_v50 }
 0x1e7   :  { %v251_v11 = vadd.f32 %v250_v8, %v249_v7 }
 0x1e9   :  { %v252_v12 = vrot.slane %v251_v11, 4 }
 0x1eb   :  { %v253_v15 = vadd.f32 %v252_v12, %v251_v11 }
 0x1ed   :  { %v254_v16 = vrot.slane %v253_v15, 2 }
 0x1ef   :  { %v255_v19 = vadd.f32 %v254_v16, %v253_v15 }
 0x1f1   :  { %v256_v20 = vrot.slane %v255_v19, 1 }
 0x1f3   :  { %v257_v22 = vadd.f32 %v256_v20, %v255_v19 }
 0x1f5   :  { %v260_v23 = vmul.f32 %v257_v22, %v972_v2  ;;  %v261_v24 = vmul.f32 %v257_v22, %v974_v3 }
 0x1f7   :  { %v265_v25 = vpack.c.bf16 %v261_v24, %v260_v23 }
 0x1f9   :  { %602 = vmatprep.mubr.bf16.mxu0 %v265_v25 }
 0x245   :  { %v169_v26 = vpop.xlane.xlu0 %168 }
 0x246   :  { %780 = vrcp.f32 %v169_v26 }
 0x249   :  { %v172_v27 = vpop.xlane.xlu1 %171 }
 0x24a   :  { %782 = vrcp.f32 %v172_v27 }
 0x250   :  { %v781_v28 = vpop.eup %780 }
 0x251   :  { %v175_v30 = vmul.f32 %v781_v28, %v994_v39  ;;  %v755_v39 = vld [vmem:[#allocation8 + $0x20] sm:$0xff]  }
 0x254   :  { %v783_v29 = vpop.eup %782 }
 0x255   :  { %v176_v31 = vmul.f32 %v783_v29, %v998_v43  ;;  %v759_v43 = vld [vmem:[#allocation8 + $0x28] sm:$0xff]  }
 0x257   :  { %v177_v33 = vpack.c.bf16 %v176_v31, %v175_v30 }
 0x259   :  { %725 = vmatmul.mubr.msk.bf16.vlgmr.msra.gmra.mrb[0].mxu1 %vm154_vm1, %v177_v33 }
 0x25a   :  { %673 = vmatpush3.bf16.msra.mxu1 %v739_v32 }
 0x25b   :  { %674 = vmatprep.subr.bf16.mxu1 %v742_v34 }
 0x25e   :  { %675 = vmatpush3.bf16.msra.mxu1 %v743_v35 }
 0x25f   :  { %676 = vmatprep.subr.bf16.mxu1 %v746_v36 }
 0x262   :  { %677 = vmatpush3.bf16.msra.mxu1 %v747_v37 }
 0x263   :  { %678 = vmatprep.subr.bf16.mxu1 %v750_v38 }
 0x266   :  { %679 = vmatpush3.bf16.msra.mxu1 %v751_v40 }
 0x267   :  { %680 = vmatprep.subr.bf16.mxu1 %v754_v41 }
 0x26a   :  { %681 = vmatpush3.bf16.msra.mxu1 %v755_v39 }
 0x26b   :  { %682 = vmatprep.subr.bf16.mxu1 %v758_v42 }
 0x26e   :  { %683 = vmatpush3.bf16.msra.mxu1 %v759_v43 }
 0x26f   :  { %684 = vmatprep.subr.bf16.mxu1 %v762_v44 }
 0x272   :  { %685 = vmatpush3.bf16.msra.mxu1 %v763_v45 }
 0x273   :  { %686 = vmatprep.subr.bf16.mxu1 %v766_v47 }
 0x276   :  { %687 = vmatpush3.bf16.msra.mxu1 %v767_v48 }
 0x32c   :  { %v219_v51 = vpop.f32.mrb[0].mxu1 }
 0x32d   :  { %v726_v52 = vpop.f32.mrb[1].mxu1  ;;  %v258_v55 = vmul.f32 %v219_v51, %v972_v2 }
 0x32e   :  { %v222_v53 = vpop.f32.mrb[2].mxu1 }
 0x32f   :  { %v259_v56 = vmul.f32 %v222_v53, %v974_v3  ;;  %v263_v57 = vpack.c.bf16 %v222_v53, %v219_v51  ;;  %v727_v58 = vpop.f32.mrb[3].mxu1 }
 0x331   :  { %v264_v59 = vpack.c.bf16 %v259_v56, %v258_v55  ;;  %561 = vmatprep.mubr.bf16.mxu1 %v263_v57 }
 0x332   :  { %562 = vmatmul.mubr.bf16.vlgmr.msra.gmra.mrb[4].mxu1 %v262_v54 }
 0x333   :  { %603 = vmatmul.mubr.bf16.vlgmr.msra.gmra.mrb[4].mxu0 %v264_v59 }
 0x405   :  { %v688_v60 = vpop.f32.mrb[4].mxu1 }
 0x406   :  { %v689_v62 = vpop.f32.mrb[5].mxu1  ;;  %v710_v63 = vpop.f32.mrb[4].mxu0 }
 0x407   :  { %v690_v0 = vadd.f32 %v689_v62, %v688_v60  ;;  %v691_v1 = vpop.f32.mrb[6].mxu1  ;;  %v711_v4 = vpop.f32.mrb[5].mxu0 }
 0x408   :  { %v712_v5 = vadd.f32 %v711_v4, %v710_v63  ;;  %v692_v2 = vpop.f32.mrb[7].mxu1  ;;  %v713_v6 = vpop.f32.mrb[6].mxu0 }
 0x409   :  { %v564_v3 = vadd.f32 %v690_v0, %v635_v61  ;;  %v693_v7 = vadd.f32 %v692_v2, %v691_v1  ;;  %v714_v8 = vpop.f32.mrb[7].mxu0 }
 0x40a   :  { %v715_v9 = vadd.f32 %v714_v8, %v713_v6 }
 0x40b   :  { %v605_v10 = vadd.f32 %v712_v5, %v564_v3  ;;  %v567_v11 = vadd.f32 %v693_v7, %v635_v61 }
 0x40d   :  { %611 = vst [vmem:[#allocation9] sm:$0xff] %v605_v10  ;;  %v608_v12 = vadd.f32 %v715_v9, %v567_v11 }
 0x40f   :  { %612 = vst [vmem:[#allocation9 + $0x8] sm:$0xff] %v608_v12 }
 0x410   :  { %861 = shalt.err (!%p858_p0)
}
 0x411   :  { %s862_s9 = scalar_lea.hbm %s1039_s8, 256 }
 0x412   :  { %p863_p1 = scmp.ne.s32.totalorder %s1039_s8, %s862_s9  ;;  %p866_p2 = scmp.lt.u32.totalorder %s862_s9, %s1039_s8 }
 0x414   :  { %p868_p3 = pnand %p866_p2, %p863_p1 }
 0x416   :  { %871 = shalt.err (!%p868_p3)
}
 0x417   :  { %624 = dma.vmem_to_hbm [thread:$0]  %s619_s30, 256, %s1039_s8, [#allocation5], %s879_s15, %s879_s15, %s880_s16  }
 0x418   :  { %876 = dma.done.wait [#allocation5], 256  }
 0x419   :  { %877 = vsyncadd [#allocation5], 4294967040 }
 0x41a   :  { %628 = vsyncpa [#allocation4], 1 }
 0x41b   :  { %629 = vsyncpa [#allocation7], 1 }
 0x41c   :  { %630 = vsyncpa [#allocation5], 1 }

</bundles_post_ra>
